<compile_context>
chip_gen: v6e
topology: v6e:2x2x1
jax: 0.10.0
libtpu: 0.0.40
codegen_flags: <defaults>
</compile_context>

<pallas_src>
import functools

import jax
import jax.numpy as jnp
import numpy as np
from jax import lax
from jax.experimental import pallas as pl
from jax.experimental.pallas import tpu as pltpu


def _make_conv_meanpool_kernel(taps, H, W2):
    """taps: static list of (row_off, col_off) into the column-paired input."""

    def kernel(x_ref, w_ref, b_ref, o_ref):
        # x_ref: (H+2p, W2+p, 2*Cin)  padded NHWC input, adjacent W cols paired
        # w_ref: (T, 2*Cin, 128)      pool-folded weight tile
        # b_ref: (1, 128)             bias tile
        # o_ref: (H2, W2, 128)        pooled conv output tile (lane-dense)
        cin2 = x_ref.shape[-1]
        cp = o_ref.shape[-1]
        acc = jnp.zeros((H * W2, cp), jnp.float32)
        for t, (dr, dc) in enumerate(taps):
            patch = x_ref[dr:dr + H, dc:dc + W2, :]        # unit-stride slice
            acc = acc + jnp.dot(patch.reshape(H * W2, cin2), w_ref[t],
                                preferred_element_type=jnp.float32)
        # acc rows are the W-pooled conv rows (already scaled by 1/4);
        # pool the H direction by summing adjacent row pairs (free reshape).
        half = acc.reshape(H // 2, 2, W2, cp)
        pooled = half[:, 0] + half[:, 1]
        o_ref[...] = (pooled + b_ref[...]).astype(o_ref.dtype)

    return kernel


@functools.partial(jax.jit, static_argnums=(3,))
def conv_mean_pool(x, weight, bias, k_size):
    """x: (N, Cin, H, W) NCHW. weight: (Cout, Cin, k, k) OIHW. bias: (Cout,)."""
    N, C, H, W = x.shape
    Co = weight.shape[0]
    k = k_size
    assert k % 2 == 1, "odd kernel size expected (padding=(k-1)//2)"
    assert H % 2 == 0 and W % 2 == 0, "even spatial dims expected for 2x2 pool"
    p = (k - 1) // 2
    H2, W2 = H // 2, W // 2
    Hp, W2p = H + 2 * p, W2 + p          # (W+2p)//2 paired columns
    CO_T = 128
    Cp = pl.cdiv(Co, CO_T) * CO_T

    # ---- glue: NCHW -> padded NHWC, pair adjacent W columns into channels ----
    x_nhwc = jnp.transpose(x, (0, 2, 3, 1))
    x_pad = jnp.pad(x_nhwc, ((0, 0), (p, p), (p, p), (0, 0)))
    x_r = x_pad.reshape(N, Hp, W2p, 2 * C)          # free row-major reshape

    # ---- glue: fold the 2x2 mean (W direction + 1/4 factor) into weights ----
    w_hwio = jnp.transpose(weight, (2, 3, 1, 0))            # (k, k, Cin, Cout)
    wz = jnp.pad(w_hwio, ((0, 0), (1, 1), (0, 0), (0, 0)))
    # Wv[kh, u] = 0.25*(W[kh, u] + W[kh, u-1]),  u in [0, k]
    wv = 0.25 * (wz[:, 1:k + 2] + wz[:, 0:k + 1])           # (k, k+1, Cin, Cout)
    # fold u = 2q + r into the 2*Cin channel axis (row-major reshape)
    w_taps = wv.reshape(k * ((k + 1) // 2), 2 * C, Co)
    w_taps = jnp.pad(w_taps, ((0, 0), (0, 0), (0, Cp - Co)))
    b_row = jnp.pad(bias, (0, Cp - Co)).reshape(1, Cp)

    taps = tuple((kh, q) for kh in range(k) for q in range((k + 1) // 2))
    T = len(taps)

    kernel = _make_conv_meanpool_kernel(taps, H, W2)
    out = pl.pallas_call(
        kernel,
        out_shape=jax.ShapeDtypeStruct((N, H2, W2, Cp), jnp.float32),
        grid=(N, Cp // CO_T),
        in_specs=[
            pl.BlockSpec((None, Hp, W2p, 2 * C), lambda n, j: (n, 0, 0, 0)),
            pl.BlockSpec((T, 2 * C, CO_T), lambda n, j: (0, 0, j)),
            pl.BlockSpec((1, CO_T), lambda n, j: (0, j)),
        ],
        out_specs=pl.BlockSpec((None, H2, W2, CO_T), lambda n, j: (n, 0, 0, j)),
        compiler_params=pltpu.CompilerParams(
            dimension_semantics=("parallel", "parallel")),
    )(x_r, w_taps, b_row)

    # (N, H2, W2, Cp) -> (N, Cout, H2, W2).  Small tensor; single relayout pass
    # kept in the wrapper to match the PyTorch NCHW output contract.
    out = jnp.transpose(out[..., :Co], (0, 3, 1, 2))
    return out.astype(x.dtype)


# ---------------------------------------------------------------------------
# Reference (plain JAX) for sanity checking: conv -> bias -> 2x2 mean-pool.
# ---------------------------------------------------------------------------
def conv_mean_pool_ref(x, weight, bias, k_size):
    p = (k_size - 1) // 2
    out = lax.conv_general_dilated(
        x, weight, window_strides=(1, 1), padding=((p, p), (p, p)),
        dimension_numbers=("NCHW", "OIHW", "NCHW"))
    out = out + bias.reshape(1, -1, 1, 1)
    return (out[:, :, 0::2, 0::2] + out[:, :, 1::2, 0::2]
            + out[:, :, 0::2, 1::2] + out[:, :, 1::2, 1::2]) / 4.0


if __name__ == "__main__":
    key = jax.random.PRNGKey(0)
    k_x, k_w, k_b = jax.random.split(key, 3)

    # Small shapes consistent with the module's forward.
    N, C_in, H, W = 2, 4, 16, 16
    C_out, k_size = 8, 3

    x = jax.random.normal(k_x, (N, C_in, H, W), dtype=jnp.float32)

    # Deterministic Conv2d-style init (kaiming-uniform-like bounds).
    fan_in = C_in * k_size * k_size
    bound = 1.0 / np.sqrt(fan_in)
    weight = jax.random.uniform(k_w, (C_out, C_in, k_size, k_size),
                                minval=-bound, maxval=bound, dtype=jnp.float32)
    bias = jax.random.uniform(k_b, (C_out,), minval=-bound, maxval=bound,
                              dtype=jnp.float32)

    out = jax.block_until_ready(conv_mean_pool(x, weight, bias, k_size))
    ref = jax.block_until_ready(conv_mean_pool_ref(x, weight, bias, k_size))

    assert out.shape == (N, C_out, H // 2, W // 2), out.shape
    np.testing.assert_allclose(np.asarray(out), np.asarray(ref),
                               rtol=1e-5, atol=1e-5)

    print("KERNEL_OK")
</pallas_src>

<mosaic_0001>
module attributes {stable_mosaic.version = 11 : i64} {
  func.func @kernel(%arg0: i32, %arg1: i32, %arg2: memref<1x18x9x8xf32, #tpu.memory_space<vmem>>, %arg3: memref<6x8x128xf32, #tpu.memory_space<vmem>>, %arg4: memref<1x128xf32, #tpu.memory_space<vmem>>, %arg5: memref<1x8x8x128xf32, #tpu.memory_space<vmem>>) attributes {dimension_semantics = [#tpu.dimension_semantics<parallel>, #tpu.dimension_semantics<parallel>], iteration_bounds = array<i64: 2, 1>, scalar_prefetch = 0 : i64, scratch_operands = 0 : i64, tpu.core_type = #tpu.core_type<tc>, window_params = [{transform_indices = @transform_0, window_bounds = array<i64: 1, 18, 9, 8>}, {transform_indices = @transform_1, window_bounds = array<i64: 6, 8, 128>}, {transform_indices = @transform_2, window_bounds = array<i64: 1, 128>}, {transform_indices = @transform_3, window_bounds = array<i64: 1, 8, 8, 128>}]} {
    %cst = arith.constant 0.000000e+00 : f32
    %0 = vector.broadcast %cst : f32 to vector<128x128xf32>
    %c0 = arith.constant 0 : index
    %c0_0 = arith.constant 0 : index
    %c0_1 = arith.constant 0 : index
    %c0_2 = arith.constant 0 : index
    %1 = vector.load %arg2[%c0, %c0_0, %c0_1, %c0_2] : memref<1x18x9x8xf32, #tpu.memory_space<vmem>>, vector<1x16x8x8xf32>
    %2 = vector.shape_cast %1 : vector<1x16x8x8xf32> to vector<16x8x8xf32>
    %3 = vector.shape_cast %2 : vector<16x8x8xf32> to vector<128x8xf32>
    %c0_3 = arith.constant 0 : index
    %c0_4 = arith.constant 0 : index
    %c0_5 = arith.constant 0 : index
    %4 = vector.load %arg3[%c0_3, %c0_4, %c0_5] : memref<6x8x128xf32, #tpu.memory_space<vmem>>, vector<1x8x128xf32>
    %5 = vector.shape_cast %4 : vector<1x8x128xf32> to vector<8x128xf32>
    %cst_6 = arith.constant dense<0.000000e+00> : vector<128x128xf32>
    %6 = tpu.matmul %3, %5, %cst_6 {dimension_numbers = #tpu.dot_dimension_numbers<[1], [0], [0], [1], [0, 0, 1, 1], [], []>} : vector<128x8xf32>, vector<8x128xf32>, vector<128x128xf32> -> vector<128x128xf32>
    %7 = arith.addf %0, %6 : vector<128x128xf32>
    %c0_7 = arith.constant 0 : index
    %c0_8 = arith.constant 0 : index
    %c1 = arith.constant 1 : index
    %c0_9 = arith.constant 0 : index
    %8 = vector.load %arg2[%c0_7, %c0_8, %c1, %c0_9] : memref<1x18x9x8xf32, #tpu.memory_space<vmem>>, vector<1x16x8x8xf32>
    %9 = vector.shape_cast %8 : vector<1x16x8x8xf32> to vector<16x8x8xf32>
    %10 = vector.shape_cast %9 : vector<16x8x8xf32> to vector<128x8xf32>
    %c1_10 = arith.constant 1 : index
    %c0_11 = arith.constant 0 : index
    %c0_12 = arith.constant 0 : index
    %11 = vector.load %arg3[%c1_10, %c0_11, %c0_12] : memref<6x8x128xf32, #tpu.memory_space<vmem>>, vector<1x8x128xf32>
    %12 = vector.shape_cast %11 : vector<1x8x128xf32> to vector<8x128xf32>
    %cst_13 = arith.constant dense<0.000000e+00> : vector<128x128xf32>
    %13 = tpu.matmul %10, %12, %cst_13 {dimension_numbers = #tpu.dot_dimension_numbers<[1], [0], [0], [1], [0, 0, 1, 1], [], []>} : vector<128x8xf32>, vector<8x128xf32>, vector<128x128xf32> -> vector<128x128xf32>
    %14 = arith.addf %7, %13 : vector<128x128xf32>
    %c0_14 = arith.constant 0 : index
    %c1_15 = arith.constant 1 : index
    %c0_16 = arith.constant 0 : index
    %c0_17 = arith.constant 0 : index
    %15 = vector.load %arg2[%c0_14, %c1_15, %c0_16, %c0_17] : memref<1x18x9x8xf32, #tpu.memory_space<vmem>>, vector<1x16x8x8xf32>
    %16 = vector.shape_cast %15 : vector<1x16x8x8xf32> to vector<16x8x8xf32>
    %17 = vector.shape_cast %16 : vector<16x8x8xf32> to vector<128x8xf32>
    %c2 = arith.constant 2 : index
    %c0_18 = arith.constant 0 : index
    %c0_19 = arith.constant 0 : index
    %18 = vector.load %arg3[%c2, %c0_18, %c0_19] : memref<6x8x128xf32, #tpu.memory_space<vmem>>, vector<1x8x128xf32>
    %19 = vector.shape_cast %18 : vector<1x8x128xf32> to vector<8x128xf32>
    %cst_20 = arith.constant dense<0.000000e+00> : vector<128x128xf32>
    %20 = tpu.matmul %17, %19, %cst_20 {dimension_numbers = #tpu.dot_dimension_numbers<[1], [0], [0], [1], [0, 0, 1, 1], [], []>} : vector<128x8xf32>, vector<8x128xf32>, vector<128x128xf32> -> vector<128x128xf32>
    %21 = arith.addf %14, %20 : vector<128x128xf32>
    %c0_21 = arith.constant 0 : index
    %c1_22 = arith.constant 1 : index
    %c1_23 = arith.constant 1 : index
    %c0_24 = arith.constant 0 : index
    %22 = vector.load %arg2[%c0_21, %c1_22, %c1_23, %c0_24] : memref<1x18x9x8xf32, #tpu.memory_space<vmem>>, vector<1x16x8x8xf32>
    %23 = vector.shape_cast %22 : vector<1x16x8x8xf32> to vector<16x8x8xf32>
    %24 = vector.shape_cast %23 : vector<16x8x8xf32> to vector<128x8xf32>
    %c3 = arith.constant 3 : index
    %c0_25 = arith.constant 0 : index
    %c0_26 = arith.constant 0 : index
    %25 = vector.load %arg3[%c3, %c0_25, %c0_26] : memref<6x8x128xf32, #tpu.memory_space<vmem>>, vector<1x8x128xf32>
    %26 = vector.shape_cast %25 : vector<1x8x128xf32> to vector<8x128xf32>
    %cst_27 = arith.constant dense<0.000000e+00> : vector<128x128xf32>
    %27 = tpu.matmul %24, %26, %cst_27 {dimension_numbers = #tpu.dot_dimension_numbers<[1], [0], [0], [1], [0, 0, 1, 1], [], []>} : vector<128x8xf32>, vector<8x128xf32>, vector<128x128xf32> -> vector<128x128xf32>
    %28 = arith.addf %21, %27 : vector<128x128xf32>
    %c0_28 = arith.constant 0 : index
    %c2_29 = arith.constant 2 : index
    %c0_30 = arith.constant 0 : index
    %c0_31 = arith.constant 0 : index
    %29 = vector.load %arg2[%c0_28, %c2_29, %c0_30, %c0_31] : memref<1x18x9x8xf32, #tpu.memory_space<vmem>>, vector<1x16x8x8xf32>
    %30 = vector.shape_cast %29 : vector<1x16x8x8xf32> to vector<16x8x8xf32>
    %31 = vector.shape_cast %30 : vector<16x8x8xf32> to vector<128x8xf32>
    %c4 = arith.constant 4 : index
    %c0_32 = arith.constant 0 : index
    %c0_33 = arith.constant 0 : index
    %32 = vector.load %arg3[%c4, %c0_32, %c0_33] : memref<6x8x128xf32, #tpu.memory_space<vmem>>, vector<1x8x128xf32>
    %33 = vector.shape_cast %32 : vector<1x8x128xf32> to vector<8x128xf32>
    %cst_34 = arith.constant dense<0.000000e+00> : vector<128x128xf32>
    %34 = tpu.matmul %31, %33, %cst_34 {dimension_numbers = #tpu.dot_dimension_numbers<[1], [0], [0], [1], [0, 0, 1, 1], [], []>} : vector<128x8xf32>, vector<8x128xf32>, vector<128x128xf32> -> vector<128x128xf32>
    %35 = arith.addf %28, %34 : vector<128x128xf32>
    %c0_35 = arith.constant 0 : index
    %c2_36 = arith.constant 2 : index
    %c1_37 = arith.constant 1 : index
    %c0_38 = arith.constant 0 : index
    %36 = vector.load %arg2[%c0_35, %c2_36, %c1_37, %c0_38] : memref<1x18x9x8xf32, #tpu.memory_space<vmem>>, vector<1x16x8x8xf32>
    %37 = vector.shape_cast %36 : vector<1x16x8x8xf32> to vector<16x8x8xf32>
    %38 = vector.shape_cast %37 : vector<16x8x8xf32> to vector<128x8xf32>
    %c5 = arith.constant 5 : index
    %c0_39 = arith.constant 0 : index
    %c0_40 = arith.constant 0 : index
    %39 = vector.load %arg3[%c5, %c0_39, %c0_40] : memref<6x8x128xf32, #tpu.memory_space<vmem>>, vector<1x8x128xf32>
    %40 = vector.shape_cast %39 : vector<1x8x128xf32> to vector<8x128xf32>
    %cst_41 = arith.constant dense<0.000000e+00> : vector<128x128xf32>
    %41 = tpu.matmul %38, %40, %cst_41 {dimension_numbers = #tpu.dot_dimension_numbers<[1], [0], [0], [1], [0, 0, 1, 1], [], []>} : vector<128x8xf32>, vector<8x128xf32>, vector<128x128xf32> -> vector<128x128xf32>
    %42 = arith.addf %35, %41 : vector<128x128xf32>
    %43 = vector.shape_cast %42 : vector<128x128xf32> to vector<8x2x8x128xf32>
    %44 = vector.extract_strided_slice %43 {offsets = [0, 0, 0, 0], sizes = [8, 1, 8, 128], strides = [1, 1, 1, 1]} : vector<8x2x8x128xf32> to vector<8x1x8x128xf32>
    %45 = vector.shape_cast %44 : vector<8x1x8x128xf32> to vector<8x8x128xf32>
    %46 = vector.extract_strided_slice %43 {offsets = [0, 1, 0, 0], sizes = [8, 1, 8, 128], strides = [1, 1, 1, 1]} : vector<8x2x8x128xf32> to vector<8x1x8x128xf32>
    %47 = vector.shape_cast %46 : vector<8x1x8x128xf32> to vector<8x8x128xf32>
    %48 = arith.addf %45, %47 : vector<8x8x128xf32>
    %c0_42 = arith.constant 0 : index
    %c0_43 = arith.constant 0 : index
    %49 = vector.load %arg4[%c0_42, %c0_43] : memref<1x128xf32, #tpu.memory_space<vmem>>, vector<1x128xf32>
    %50 = vector.shape_cast %49 : vector<1x128xf32> to vector<1x1x128xf32>
    %51 = vector.broadcast %50 : vector<1x1x128xf32> to vector<8x8x128xf32>
    %52 = arith.addf %48, %51 : vector<8x8x128xf32>
    %c0_44 = arith.constant 0 : index
    %c0_45 = arith.constant 0 : index
    %c0_46 = arith.constant 0 : index
    %c0_47 = arith.constant 0 : index
    %53 = vector.load %arg5[%c0_44, %c0_45, %c0_46, %c0_47] : memref<1x8x8x128xf32, #tpu.memory_space<vmem>>, vector<1x8x8x128xf32>
    %54 = vector.shape_cast %53 : vector<1x8x8x128xf32> to vector<8x8x128xf32>
    %55 = vector.shape_cast %52 : vector<8x8x128xf32> to vector<1x8x8x128xf32>
    tpu.vector_store %arg5[%c0_44, %c0_45, %c0_46, %c0_47], %55 {strides = array<i32>} : memref<1x8x8x128xf32, #tpu.memory_space<vmem>>, vector<1x8x8x128xf32>,
    return
  }
  func.func @transform_0(%arg0: i32, %arg1: i32) -> (i32, i32, i32, i32) {
    %c0_i32 = arith.constant 0 : i32
    %c0_i32_0 = arith.constant 0 : i32
    %c0_i32_1 = arith.constant 0 : i32
    %c0_i32_2 = arith.constant 0 : i32
    return %arg0, %c0_i32, %c0_i32_0, %c0_i32_1 : i32, i32, i32, i32
  }
  func.func @transform_1(%arg0: i32, %arg1: i32) -> (i32, i32, i32) {
    %c0_i32 = arith.constant 0 : i32
    %c0_i32_0 = arith.constant 0 : i32
    %c0_i32_1 = arith.constant 0 : i32
    return %c0_i32, %c0_i32_0, %arg1 : i32, i32, i32
  }
  func.func @transform_2(%arg0: i32, %arg1: i32) -> (i32, i32) {
    %c0_i32 = arith.constant 0 : i32
    %c0_i32_0 = arith.constant 0 : i32
    return %c0_i32, %arg1 : i32, i32
  }
  func.func @transform_3(%arg0: i32, %arg1: i32) -> (i32, i32, i32, i32) {
    %c0_i32 = arith.constant 0 : i32
    %c0_i32_0 = arith.constant 0 : i32
    %c0_i32_1 = arith.constant 0 : i32
    return %arg0, %c0_i32, %c0_i32_0, %arg1 : i32, i32, i32, i32
  }
}

</mosaic_0001>

<bundles_post_ra>
// kernel: conv_mean_pool.1
= control target key start
LH: loop header
LB: loop body
LE: loop exit
PB: predicated region body
PF: predicated region fallthrough
CT: control target
= control target key end

     0   :  { %s2196_s12 = smov 0   ;;  %s2198_s13 = smov 0   ;;  %s2693_s0 = inlined_call_operand.vmem [shape: f32[2,18,9,8], index: 0, kind: input, shape index: {}]   ;;  %s2694_s1 = inlined_call_operand.vmem [shape: f32[6,8,128], index: 1, kind: input, shape index: {}]   ;;  %s2695_s2 = inlined_call_operand.vmem [shape: f32[1,128], index: 2, kind: input, shape index: {}]   ;;  %s2696_s3 = inlined_call_operand.vmem [shape: f32[2,8,8,128], index: 3, kind: output, shape index: {}]  }
   0x1   :  { %s2200_s14 = smov 0  }
   0x2 LB: > { %s25_s15 = sadd.s32 1, %s2170_s13  ;;  %p1696_p0 = scmp.ge.s32.totalorder %s2174_s14, 1  ;;  %s2174_s14 = sphi %s2200_s14, %s13_s14   ;;  %s2170_s13 = sphi %s2198_s13, %s2718_s13   ;;  %s2166_s12 = sphi %s2196_s12, %s2717_s12  }
   0x3   : > { %p27_p1 = scmp.ge.s32.totalorder %s25_s15, 2  ;;  %p168_p2 = scmp.lt.s32.totalorder %s2174_s14, 3 }
   0x5   : > { %s2720_s15 = smov (%p27_p1, %s25_s15), 0  ;;  %p169_p3 = pnand %p1696_p0, %p168_p2 }
   0x7   : > { %172 = sbr.rel (%p169_p3) target bundleno = 316 (0x13c), region = 32 }
   0xc   : > { %v1700_v0 = vld [vmem:[%s2694_s1 + $0x8] sm:$0xff]  ;;  %v238_v1 = vld [vmem:[%s2694_s1] sm:$0xff]  ;;  %p202_p4 = scmp.lt.s32.totalorder %s2166_s12, 1  ;;  %v1749_v2 = vld [vmem:[%s2694_s1 + $0x10] sm:$0xff]  ;;  %vm257_vm0 = vcmask 64512  }
   0xd   : > { %1971 = vmatprep.subr.mxu0 %v1700_v0  ;;  %1997 = vmatprep.subr.mxu1 %v238_v1  ;;  %v1782_v3 = vld [vmem:[%s2694_s1 + $0x18] sm:$0xff]  ;;  %v2257_v10 = vld [vmem:[%s2694_s1 + $0x20] sm:$0xff]  ;;  %v2262_v11 = vld [vmem:[%s2694_s1 + $0x28] sm:$0xff] }
   0xe   : > { %1972 = vmatpush3.msra.mxu0 %v1700_v0  ;;  %s2722_s12 = smov (!%p202_p4, %s2166_s12), 1  ;;  %1998 = vmatpush3.msra.mxu1 %v238_v1 }
   0xf   : > { %2023 = vmatprep.subr.mxu0 %v1749_v2  ;;  %2049 = vmatprep.subr.mxu1 %v1782_v3  ;;  %s2127_s24 = smul.u32 288, %s2722_s12  ;;  %s1868_s5 = sshll.u32 %s2722_s12, 6 }
  0x10   : > { %s2634_s10 = scalar_lea.vmem %s2696_s3, %s1868_s5 }
  0x11   : > { %s2232_s27 = scalar_lea.vmem %s2693_s0, %s2127_s24 }
  0x12   : > { %v239_v4 = vld [vmem:[%s2232_s27 + $0x1] sm:$0xff]  ;;  %v2237_v6 = vld [vmem:[%s2232_s27 + $0x11] sm:$0xff] }
  0x13   : > { %v222_v5 = vld [vmem:[%s2232_s27] sm:$0xff]  ;;  %1973 = vmatprep.mubr.msk.f32.mxu0 %vm257_vm0, %v239_v4  ;;  %v2242_v7 = vld [vmem:[%s2232_s27 + $0x10] sm:$0xff] }
  0x14   : > { %1999 = vmatprep.mubr.msk.f32.mxu1 %vm257_vm0, %v222_v5  ;;  %v2245_v8 = vld [vmem:[%s2232_s27 + $0x21] sm:$0xff]  ;;  %1974 = vmatmul.mubr.msk.f32.vlgmr.msra.gmra.mxu0 %vm257_vm0, %v2237_v6  ;;  %v2265_v12 = vld [vmem:[%s2232_s27 + $0x31] sm:$0xff] }
  0x15   : > { %v2248_v9 = vld [vmem:[%s2232_s27 + $0x20] sm:$0xff]  ;;  %2000 = vmatmul.mubr.msk.f32.vlgmr.msra.gmra.mxu1 %vm257_vm0, %v2242_v7  ;;  %2024 = vmatpush3.msra.mxu0 %v1749_v2  ;;  %v2268_v13 = vld [vmem:[%s2232_s27 + $0x30] sm:$0xff] }
  0x16   : > { %2050 = vmatpush3.msra.mxu1 %v1782_v3  ;;  %1976 = vmatprep.mubr.msk.f32.mxu0 %vm257_vm0, %v2245_v8  ;;  %v2275_v14 = vld [vmem:[%s2232_s27 + $0x41] sm:$0xff]  ;;  %v2291_v16 = vld [vmem:[%s2232_s27 + $0x51] sm:$0xff] }
  0x17   : > { %2002 = vmatprep.mubr.msk.f32.mxu1 %vm257_vm0, %v2248_v9  ;;  %v2278_v15 = vld [vmem:[%s2232_s27 + $0x40] sm:$0xff]  ;;  %2075 = vmatprep.subr.mxu0 %v2257_v10  ;;  %v2294_v17 = vld [vmem:[%s2232_s27 + $0x50] sm:$0xff] }
  0x18   : > { %2101 = vmatprep.subr.mxu1 %v2262_v11  ;;  %1977 = vmatmul.mubr.msk.f32.gmra.mxu0 %vm257_vm0, %v2265_v12  ;;  %v2297_v18 = vld [vmem:[%s2232_s27 + $0x61] sm:$0xff]  ;;  %v2311_v20 = vld [vmem:[%s2232_s27 + $0x71] sm:$0xff] }
  0x19   : > { %2003 = vmatmul.mubr.msk.f32.gmra.mxu1 %vm257_vm0, %v2268_v13  ;;  %1979 = vmatprep.mubr.msk.f32.mxu0 %vm257_vm0, %v2275_v14  ;;  %v2300_v19 = vld [vmem:[%s2232_s27 + $0x60] sm:$0xff]  ;;  %v2314_v21 = vld [vmem:[%s2232_s27 + $0x70] sm:$0xff] }
  0x1a   : > { %2005 = vmatprep.mubr.msk.f32.mxu1 %vm257_vm0, %v2278_v15  ;;  %v2317_v22 = vld [vmem:[%s2232_s27 + $0x81] sm:$0xff]  ;;  %v2331_v24 = vld [vmem:[%s2232_s27 + $0x91] sm:$0xff] }
  0x1b   : > { %v2320_v23 = vld [vmem:[%s2232_s27 + $0x80] sm:$0xff]  ;;  %v2334_v25 = vld [vmem:[%s2232_s27 + $0x90] sm:$0xff] }
  0x1c   : > { %1980 = vmatmul.mubr.msk.f32.gmra.mxu0 %vm257_vm0, %v2291_v16  ;;  %v2337_v26 = vld [vmem:[%s2232_s27 + $0xa1] sm:$0xff]  ;;  %v2351_v28 = vld [vmem:[%s2232_s27 + $0xb1] sm:$0xff] }
  0x1d   : > { %2006 = vmatmul.mubr.msk.f32.gmra.mxu1 %vm257_vm0, %v2294_v17  ;;  %1982 = vmatprep.mubr.msk.f32.mxu0 %vm257_vm0, %v2297_v18  ;;  %v2340_v27 = vld [vmem:[%s2232_s27 + $0xa0] sm:$0xff]  ;;  %v2354_v29 = vld [vmem:[%s2232_s27 + $0xb0] sm:$0xff] }
  0x1e   : > { %2008 = vmatprep.mubr.msk.f32.mxu1 %vm257_vm0, %v2300_v19  ;;  %v2357_v30 = vld [vmem:[%s2232_s27 + $0xc1] sm:$0xff]  ;;  %v2371_v32 = vld [vmem:[%s2232_s27 + $0xd1] sm:$0xff] }
  0x1f   : > { %v2360_v31 = vld [vmem:[%s2232_s27 + $0xc0] sm:$0xff]  ;;  %v2374_v33 = vld [vmem:[%s2232_s27 + $0xd0] sm:$0xff] }
  0x20   : > { %1983 = vmatmul.mubr.msk.f32.gmra.mxu0 %vm257_vm0, %v2311_v20  ;;  %v2377_v34 = vld [vmem:[%s2232_s27 + $0xe1] sm:$0xff]  ;;  %v2391_v36 = vld [vmem:[%s2232_s27 + $0xf1] sm:$0xff] }
  0x21   : > { %2009 = vmatmul.mubr.msk.f32.gmra.mxu1 %vm257_vm0, %v2314_v21  ;;  %1985 = vmatprep.mubr.msk.f32.mxu0 %vm257_vm0, %v2317_v22  ;;  %v2380_v35 = vld [vmem:[%s2232_s27 + $0xe0] sm:$0xff]  ;;  %v2394_v37 = vld [vmem:[%s2232_s27 + $0xf0] sm:$0xff] }
  0x22   : > { %2011 = vmatprep.mubr.msk.f32.mxu1 %vm257_vm0, %v2320_v23  ;;  %v1748_v38 = vld [vmem:[%s2232_s27 + $0x100] sm:$0xff]  ;;  %v1814_v40 = vld [vmem:[%s2232_s27 + $0x110] sm:$0xff] }
  0x23   : > { %v1781_v39 = vld [vmem:[%s2232_s27 + $0x101] sm:$0xff]  ;;  %v1847_v41 = vld [vmem:[%s2232_s27 + $0x111] sm:$0xff] }
  0x24   : > { %1986 = vmatmul.mubr.msk.f32.gmra.mxu0 %vm257_vm0, %v2331_v24 }
  0x25   : > { %2012 = vmatmul.mubr.msk.f32.gmra.mxu1 %vm257_vm0, %v2334_v25  ;;  %1988 = vmatprep.mubr.msk.f32.mxu0 %vm257_vm0, %v2337_v26 }
  0x26   : > { %2014 = vmatprep.mubr.msk.f32.mxu1 %vm257_vm0, %v2340_v27 }
  0x28   : > { %1989 = vmatmul.mubr.msk.f32.gmra.mxu0 %vm257_vm0, %v2351_v28 }
  0x29   : > { %2015 = vmatmul.mubr.msk.f32.gmra.mxu1 %vm257_vm0, %v2354_v29  ;;  %1991 = vmatprep.mubr.msk.f32.mxu0 %vm257_vm0, %v2357_v30 }
  0x2a   : > { %2017 = vmatprep.mubr.msk.f32.mxu1 %vm257_vm0, %v2360_v31 }
  0x2c   : > { %1992 = vmatmul.mubr.msk.f32.gmra.mxu0 %vm257_vm0, %v2371_v32 }
  0x2d   : > { %2018 = vmatmul.mubr.msk.f32.gmra.mxu1 %vm257_vm0, %v2374_v33  ;;  %1994 = vmatprep.mubr.msk.f32.mxu0 %vm257_vm0, %v2377_v34 }
  0x2e   : > { %2020 = vmatprep.mubr.msk.f32.mxu1 %vm257_vm0, %v2380_v35 }
  0x30   : > { %1995 = vmatmul.mubr.msk.f32.gmra.mxu0 %vm257_vm0, %v2391_v36 }
  0x31   : > { %2021 = vmatmul.mubr.msk.f32.gmra.mxu1 %vm257_vm0, %v2394_v37  ;;  %2025 = vmatprep.mubr.msk.f32.mxu0 %vm257_vm0, %v2242_v7 }
  0x32   : > { %2051 = vmatprep.mubr.msk.f32.mxu1 %vm257_vm0, %v2237_v6 }
  0x34   : > { %2026 = vmatmul.mubr.msk.f32.vlgmr.msra.gmra.mxu0 %vm257_vm0, %v2248_v9 }
  0x35   : > { %2052 = vmatmul.mubr.msk.f32.vlgmr.msra.gmra.mxu1 %vm257_vm0, %v2245_v8  ;;  %2076 = vmatpush3.msra.mxu0 %v2257_v10 }
  0x36   : > { %2102 = vmatpush3.msra.mxu1 %v2262_v11  ;;  %2028 = vmatprep.mubr.msk.f32.mxu0 %vm257_vm0, %v2268_v13 }
  0x37   : > { %2054 = vmatprep.mubr.msk.f32.mxu1 %vm257_vm0, %v2265_v12 }
  0x38   : > { %2029 = vmatmul.mubr.msk.f32.gmra.mxu0 %vm257_vm0, %v2278_v15 }
  0x39   : > { %2055 = vmatmul.mubr.msk.f32.gmra.mxu1 %vm257_vm0, %v2275_v14  ;;  %2031 = vmatprep.mubr.msk.f32.mxu0 %vm257_vm0, %v2294_v17 }
  0x3a   : > { %2057 = vmatprep.mubr.msk.f32.mxu1 %vm257_vm0, %v2291_v16 }
  0x3c   : > { %2032 = vmatmul.mubr.msk.f32.gmra.mxu0 %vm257_vm0, %v2300_v19 }
  0x3d   : > { %2058 = vmatmul.mubr.msk.f32.gmra.mxu1 %vm257_vm0, %v2297_v18  ;;  %2034 = vmatprep.mubr.msk.f32.mxu0 %vm257_vm0, %v2314_v21 }
  0x3e   : > { %2060 = vmatprep.mubr.msk.f32.mxu1 %vm257_vm0, %v2311_v20 }
  0x40   : > { %2035 = vmatmul.mubr.msk.f32.gmra.mxu0 %vm257_vm0, %v2320_v23 }
  0x41   : > { %2061 = vmatmul.mubr.msk.f32.gmra.mxu1 %vm257_vm0, %v2317_v22  ;;  %2037 = vmatprep.mubr.msk.f32.mxu0 %vm257_vm0, %v2334_v25 }
  0x42   : > { %2063 = vmatprep.mubr.msk.f32.mxu1 %vm257_vm0, %v2331_v24 }
  0x44   : > { %2038 = vmatmul.mubr.msk.f32.gmra.mxu0 %vm257_vm0, %v2340_v27 }
  0x45   : > { %2064 = vmatmul.mubr.msk.f32.gmra.mxu1 %vm257_vm0, %v2337_v26  ;;  %2040 = vmatprep.mubr.msk.f32.mxu0 %vm257_vm0, %v2354_v29 }
  0x46   : > { %2066 = vmatprep.mubr.msk.f32.mxu1 %vm257_vm0, %v2351_v28 }
  0x48   : > { %2041 = vmatmul.mubr.msk.f32.gmra.mxu0 %vm257_vm0, %v2360_v31 }
  0x49   : > { %2067 = vmatmul.mubr.msk.f32.gmra.mxu1 %vm257_vm0, %v2357_v30  ;;  %2043 = vmatprep.mubr.msk.f32.mxu0 %vm257_vm0, %v2374_v33 }
  0x4a   : > { %2069 = vmatprep.mubr.msk.f32.mxu1 %vm257_vm0, %v2371_v32 }
  0x4c   : > { %2044 = vmatmul.mubr.msk.f32.gmra.mxu0 %vm257_vm0, %v2380_v35 }
  0x4d   : > { %2070 = vmatmul.mubr.msk.f32.gmra.mxu1 %vm257_vm0, %v2377_v34  ;;  %2046 = vmatprep.mubr.msk.f32.mxu0 %vm257_vm0, %v2394_v37 }
  0x4e   : > { %2072 = vmatprep.mubr.msk.f32.mxu1 %vm257_vm0, %v2391_v36 }
  0x50   : > { %2047 = vmatmul.mubr.msk.f32.gmra.mxu0 %vm257_vm0, %v1748_v38 }
  0x51   : > { %2073 = vmatmul.mubr.msk.f32.gmra.mxu1 %vm257_vm0, %v1781_v39  ;;  %2077 = vmatprep.mubr.msk.f32.mxu0 %vm257_vm0, %v2248_v9 }
  0x52   : > { %2103 = vmatprep.mubr.msk.f32.mxu1 %vm257_vm0, %v2245_v8 }
  0x54   : > { %2078 = vmatmul.mubr.msk.f32.vlgmr.msra.gmra.mxu0 %vm257_vm0, %v2268_v13 }
  0x55   : > { %2104 = vmatmul.mubr.msk.f32.vlgmr.msra.gmra.mxu1 %vm257_vm0, %v2265_v12  ;;  %2080 = vmatprep.mubr.msk.f32.mxu0 %vm257_vm0, %v2278_v15 }
  0x56   : > { %2106 = vmatprep.mubr.msk.f32.mxu1 %vm257_vm0, %v2275_v14 }
  0x58   : > { %2081 = vmatmul.mubr.msk.f32.gmra.mxu0 %vm257_vm0, %v2294_v17 }
  0x59   : > { %2107 = vmatmul.mubr.msk.f32.gmra.mxu1 %vm257_vm0, %v2291_v16  ;;  %2083 = vmatprep.mubr.msk.f32.mxu0 %vm257_vm0, %v2300_v19 }
  0x5a   : > { %2109 = vmatprep.mubr.msk.f32.mxu1 %vm257_vm0, %v2297_v18 }
  0x5c   : > { %2084 = vmatmul.mubr.msk.f32.gmra.mxu0 %vm257_vm0, %v2314_v21 }
  0x5d   : > { %2110 = vmatmul.mubr.msk.f32.gmra.mxu1 %vm257_vm0, %v2311_v20  ;;  %2086 = vmatprep.mubr.msk.f32.mxu0 %vm257_vm0, %v2320_v23 }
  0x5e   : > { %2112 = vmatprep.mubr.msk.f32.mxu1 %vm257_vm0, %v2317_v22 }
  0x60   : > { %2087 = vmatmul.mubr.msk.f32.gmra.mxu0 %vm257_vm0, %v2334_v25 }
  0x61   : > { %2113 = vmatmul.mubr.msk.f32.gmra.mxu1 %vm257_vm0, %v2331_v24  ;;  %2089 = vmatprep.mubr.msk.f32.mxu0 %vm257_vm0, %v2340_v27 }
  0x62   : > { %2115 = vmatprep.mubr.msk.f32.mxu1 %vm257_vm0, %v2337_v26 }
  0x64   : > { %2090 = vmatmul.mubr.msk.f32.gmra.mxu0 %vm257_vm0, %v2354_v29 }
  0x65   : > { %2116 = vmatmul.mubr.msk.f32.gmra.mxu1 %vm257_vm0, %v2351_v28  ;;  %2092 = vmatprep.mubr.msk.f32.mxu0 %vm257_vm0, %v2360_v31 }
  0x66   : > { %2118 = vmatprep.mubr.msk.f32.mxu1 %vm257_vm0, %v2357_v30 }
  0x68   : > { %2093 = vmatmul.mubr.msk.f32.gmra.mxu0 %vm257_vm0, %v2374_v33 }
  0x69   : > { %2119 = vmatmul.mubr.msk.f32.gmra.mxu1 %vm257_vm0, %v2371_v32  ;;  %2095 = vmatprep.mubr.msk.f32.mxu0 %vm257_vm0, %v2380_v35 }
  0x6a   : > { %2121 = vmatprep.mubr.msk.f32.mxu1 %vm257_vm0, %v2377_v34 }
  0x6c   : > { %2096 = vmatmul.mubr.msk.f32.gmra.mxu0 %vm257_vm0, %v2394_v37 }
  0x6d   : > { %2122 = vmatmul.mubr.msk.f32.gmra.mxu1 %vm257_vm0, %v2391_v36  ;;  %2098 = vmatprep.mubr.msk.f32.mxu0 %vm257_vm0, %v1748_v38 }
  0x6e   : > { %2124 = vmatprep.mubr.msk.f32.mxu1 %vm257_vm0, %v1781_v39 }
  0x70   : > { %2099 = vmatmul.mubr.msk.f32.gmra.mxu0 %vm257_vm0, %v1814_v40 }
  0x71   : > { %2125 = vmatmul.mubr.msk.f32.gmra.mxu1 %vm257_vm0, %v1847_v41 }
  0xd4   : > { %v1975_v42 = vpop.f32.mrf.mxu0 }
  0xd5   : > { %v2001_v43 = vpop.f32.mrf.mxu1 }
  0xd6   : > { %v372_v44 = vpop.f32.mrf.mxu0  ;;  %v571_v36 = vadd.f32 %v2001_v43, %v1975_v42 }
  0xd7   : > { %v565_v45 = vpop.f32.mrf.mxu1 }
  0xd8   : > { %v1978_v46 = vpop.f32.mrf.mxu0  ;;  %v566_v39 = vadd.f32 %v565_v45, %v372_v44 }
  0xd9   : > { %v2004_v47 = vpop.f32.mrf.mxu1 }
  0xda   : > { %v2528_v48 = vpop.f32.mrf.mxu0 }
  0xdb   : > { %v575_v49 = vpop.f32.mrf.mxu1 }
  0xdc   : > { %v2530_v50 = vpop.f32.mrf.mxu0 }
  0xdd   : > { %v2532_v51 = vpop.f32.mrf.mxu1 }
  0xde   : > { %v2534_v52 = vpop.f32.mrf.mxu0  ;;  %v591_v44 = vadd.f32 %v2532_v51, %v2530_v50 }
  0xdf   : > { %v2536_v53 = vpop.f32.mrf.mxu1 }
  0xe0   : > { %v2538_v54 = vpop.f32.mrf.mxu0 }
  0xe1   : > { %v2540_v55 = vpop.f32.mrf.mxu1 }
  0xe2   : > { %v2542_v56 = vpop.f32.mrf.mxu0 }
  0xe3   : > { %v2544_v57 = vpop.f32.mrf.mxu1 }
  0xe4   : > { %v2546_v58 = vpop.f32.mrf.mxu0 }
  0xe5   : > { %v2548_v59 = vpop.f32.mrf.mxu1 }
  0xe6   : > { %v2550_v60 = vpop.f32.mrf.mxu0 }
  0xe7   : > { %v2552_v61 = vpop.f32.mrf.mxu1 }
  0xe8   : > { %v2554_v62 = vpop.f32.mrf.mxu0 }
  0xe9   : > { %v2556_v63 = vpop.f32.mrf.mxu1 }
  0xea   : > { %v2558_v0 = vpop.f32.mrf.mxu0 }
  0xeb   : > { %v2560_v1 = vpop.f32.mrf.mxu1 }
  0xec   : > { %v2562_v2 = vpop.f32.mrf.mxu0 }
  0xed   : > { %v2564_v3 = vpop.f32.mrf.mxu1 }
  0xee   : > { %v2566_v4 = vpop.f32.mrf.mxu0 }
  0xef   : > { %v2568_v5 = vpop.f32.mrf.mxu1 }
  0xf0   : > { %v2570_v6 = vpop.f32.mrf.mxu0 }
  0xf1   : > { %2697 = vst [vmem:[#allocation2_spill] sm:$0xff] %v2570_v6  ;;  %v2572_v7 = vpop.f32.mrf.mxu1 }
  0xf2   : > { %2698 = vst [vmem:[#allocation3_spill] sm:$0xff] %v2572_v7  ;;  %v2574_v8 = vpop.f32.mrf.mxu0 }
  0xf3   : > { %2699 = vst [vmem:[#allocation4_spill] sm:$0xff] %v2574_v8  ;;  %v2576_v9 = vpop.f32.mrf.mxu1  ;;  %v581_v8 = vadd.f32 %v2004_v47, %v1978_v46  ;;  %v586_v46 = vadd.f32 %v2536_v53, %v2534_v52  ;;  %v2627_v52 = vld [vmem:[%s2695_s2] ss:$0 sm:$0xff] }
  0xf4   : > { %2700 = vst [vmem:[#allocation5_spill] sm:$0xff] %v2576_v9  ;;  %v2027_v10 = vpop.f32.mrf.mxu0 }
  0xf5   : > { %v2053_v11 = vpop.f32.mrf.mxu1  ;;  %v857_v40 = vadd.f32 %v2027_v10, %v571_v36 }
  0xf6   : > { %v777_v12 = vpop.f32.mrf.mxu0 }
  0xf7   : > { %v1004_v13 = vpop.f32.mrf.mxu1  ;;  %v856_v7 = vadd.f32 %v777_v12, %v566_v39 }
  0xf8   : > { %v2030_v14 = vpop.f32.mrf.mxu0 }
  0xf9   : > { %v2056_v15 = vpop.f32.mrf.mxu1  ;;  %v859_v42 = vadd.f32 %v2030_v14, %v581_v8  ;;  %v1083_v45 = vadd.f32 %v1004_v13, %v856_v7  ;;  %v596_v13 = vadd.f32 %v2544_v57, %v2542_v56 }
  0xfa   : > { %v787_v16 = vpop.f32.mrf.mxu0 }
  0xfb   : > { %v1014_v17 = vpop.f32.mrf.mxu1  ;;  %v1086_v39 = vadd.f32 %v2056_v15, %v859_v42  ;;  %v621_v42 = vadd.f32 %v2556_v63, %v2554_v62 }
  0xfc   : > { %v2033_v18 = vpop.f32.mrf.mxu0 }
  0xfd   : > { %v2059_v19 = vpop.f32.mrf.mxu1 }
  0xfe   : > { %v797_v20 = vpop.f32.mrf.mxu0 }
  0xff   : > { %v1024_v21 = vpop.f32.mrf.mxu1 }
 0x100   : > { %v2036_v22 = vpop.f32.mrf.mxu0 }
 0x101   : > { %v2578_v23 = vpop.f32.mrf.mxu1 }
 0x102   : > { %v807_v24 = vpop.f32.mrf.mxu0 }
 0x103   : > { %v2580_v25 = vpop.f32.mrf.mxu1 }
 0x104   : > { %v2582_v26 = vpop.f32.mrf.mxu0 }
 0x105   : > { %v2584_v27 = vpop.f32.mrf.mxu1 }
 0x106   : > { %v2586_v28 = vpop.f32.mrf.mxu0 }
 0x107   : > { %v2588_v29 = vpop.f32.mrf.mxu1 }
 0x108   : > { %v2590_v30 = vpop.f32.mrf.mxu0 }
 0x109   : > { %v2592_v31 = vpop.f32.mrf.mxu1  ;;  %v867_v62 = vadd.f32 %v2590_v30, %v621_v42  ;;  %v626_v30 = vadd.f32 %v2568_v5, %v2566_v4 }
 0x10a   : > { %v2594_v32 = vpop.f32.mrf.mxu0 }
 0x10b   : > { %v2596_v33 = vpop.f32.mrf.mxu1 }
 0x10c   : > { %2701 = vst [vmem:[#allocation6_spill] sm:$0xff] %v2596_v33  ;;  %v2598_v34 = vpop.f32.mrf.mxu0 }
 0x10d   : > { %2702 = vst [vmem:[#allocation7_spill] sm:$0xff] %v2598_v34  ;;  %v2600_v35 = vpop.f32.mrf.mxu1  ;;  %v576_v34 = vadd.f32 %v575_v49, %v2528_v48  ;;  %v601_v48 = vadd.f32 %v2540_v55, %v2538_v54  ;;  %v860_v49 = vadd.f32 %v797_v20, %v586_v46 }
 0x10e   : > { %2703 = vst [vmem:[#allocation8_spill] sm:$0xff] %v2600_v35  ;;  %v2602_v37 = vpop.f32.mrf.mxu0  ;;  %v1084_v35 = vadd.f32 %v2053_v11, %v857_v40 }
 0x10f   : > { %2704 = vst [vmem:[#allocation9_spill] sm:$0xff] %v2602_v37  ;;  %v2604_v38 = vpop.f32.mrf.mxu1  ;;  %v858_v10 = vadd.f32 %v787_v16, %v576_v34  ;;  %v863_v54 = vadd.f32 %v2036_v22, %v601_v48  ;;  %v1087_v20 = vadd.f32 %v1024_v21, %v860_v49 }
 0x110   : > { %v2606_v41 = vpop.f32.mrf.mxu0 }
 0x111   : > { %v2608_v9 = vpop.f32.mrf.mxu1  ;;  %v1085_v14 = vadd.f32 %v1014_v17, %v858_v10  ;;  %v611_v17 = vadd.f32 %v2548_v59, %v2546_v58  ;;  %v1090_v59 = vadd.f32 %v2578_v23, %v863_v54 }
 0x112   : > { %2705 = vst [vmem:[#allocation10_spill] sm:$0xff] %v2608_v9  ;;  %v2610_v6 = vpop.f32.mrf.mxu0 }
 0x113   : > { %v2612_v33 = vpop.f32.mrf.mxu1  ;;  %v865_v21 = vadd.f32 %v2582_v26, %v611_v17  ;;  %v616_v26 = vadd.f32 %v2560_v1, %v2558_v0 }
 0x114   : > { %2706 = vst [vmem:[#allocation11_spill] sm:$0xff] %v2612_v33  ;;  %v2079_v43 = vpop.f32.mrf.mxu0  ;;  %v861_v33 = vadd.f32 %v2033_v18, %v591_v44 }
 0x115   : > { %v2105_v37 = vpop.f32.mrf.mxu1  ;;  %v1312_v36 = vadd.f32 %v2079_v43, %v1084_v35  ;;  %v866_v48 = vadd.f32 %v2594_v32, %v616_v26  ;;  %v2708_v32 = vld [vmem:[#allocation2_spill] sm:$0xff] }
 0x116   : > { %v1232_v47 = vpop.f32.mrf.mxu0  ;;  %v1088_v16 = vadd.f32 %v2059_v19, %v861_v33  ;;  %v606_v33 = vadd.f32 %v2552_v61, %v2550_v60  ;;  %v2711_v54 = vld [vmem:[#allocation9_spill] sm:$0xff] }
 0x117   : > { %v1459_v12 = vpop.f32.mrf.mxu1  ;;  %v1311_v9 = vadd.f32 %v1232_v47, %v1083_v45  ;;  %v1539_v50 = vadd.f32 %v2105_v37, %v1312_v36 }
 0x118   : > { %v2082_v8 = vpop.f32.mrf.mxu0  ;;  %v864_v44 = vadd.f32 %v2586_v28, %v606_v33  ;;  %v631_v28 = vadd.f32 %v2564_v3, %v2562_v2 }
 0x119   : > { %v2108_v11 = vpop.f32.mrf.mxu1  ;;  %v1538_v51 = vadd.f32 %v1459_v12, %v1311_v9  ;;  %v1314_v7 = vadd.f32 %v2082_v8, %v1086_v39  ;;  %v862_v9 = vadd.f32 %v807_v24, %v596_v13  ;;  %v1092_v12 = vadd.f32 %v2584_v27, %v865_v21  ;;  %v2709_v13 = vld [vmem:[#allocation3_spill] sm:$0xff] }
 0x11a   : > { %v1242_v53 = vpop.f32.mrf.mxu0  ;;  %v1091_v39 = vadd.f32 %v2588_v29, %v864_v44 }
 0x11b   : > { %v1469_v15 = vpop.f32.mrf.mxu1  ;;  %v1554_v55 = vadd.f32 %v1539_v50, %v1538_v51  ;;  %v1313_v18 = vadd.f32 %v1242_v53, %v1085_v14  ;;  %v1541_v35 = vadd.f32 %v2108_v11, %v1314_v7  ;;  %v1089_v43 = vadd.f32 %v2580_v25, %v862_v9  ;;  %v2707_v7 = vld [vmem:[#allocation7_spill] sm:$0xff]  ;;  %v2712_v9 = vld [vmem:[#allocation4_spill] sm:$0xff] }
 0x11c   : > { %v2085_v56 = vpop.f32.mrf.mxu0  ;;  %v1094_v51 = vadd.f32 %v2592_v31, %v867_v62  ;;  %v869_v2 = vadd.f32 %v2707_v7, %v631_v28  ;;  %v641_v53 = vadd.f32 %v2709_v13, %v2708_v32  ;;  %v2716_v26 = vld [vmem:[#allocation11_spill] sm:$0xff] }
 0x11d   : > { %v2111_v57 = vpop.f32.mrf.mxu1  ;;  %v1569_v34 = vadd.f32 %v2627_v52, %v1554_v55  ;;  %v1540_v19 = vadd.f32 %v1469_v15, %v1313_v18  ;;  %v1316_v22 = vadd.f32 %v2085_v56, %v1088_v16  ;;  %v2710_v15 = vld [vmem:[#allocation6_spill] sm:$0xff]  ;;  %v868_v55 = vadd.f32 %v2711_v54, %v626_v30  ;;  %v2713_v56 = vld [vmem:[#allocation5_spill] sm:$0xff] }
 0x11e   : > { %v1252_v37 = vpop.f32.mrf.mxu0  ;;  %v1093_v16 = vadd.f32 %v2710_v15, %v866_v48  ;;  %v871_v33 = vadd.f32 %v2606_v41, %v641_v53 }
 0x11f   : > { %v1479_v58 = vpop.f32.mrf.mxu1  ;;  %1577 = vst [vmem:[%s2634_s10] sm:$0xff] %v1569_v34  ;;  %v1555_v24 = vadd.f32 %v1541_v35, %v1540_v19  ;;  %v1315_v40 = vadd.f32 %v1252_v37, %v1087_v20  ;;  %v1543_v61 = vadd.f32 %v2111_v57, %v1316_v22  ;;  %v636_v57 = vadd.f32 %v2713_v56, %v2712_v9  ;;  %v2714_v19 = vld [vmem:[#allocation8_spill] sm:$0xff] }
 0x120   : > { %v2088_v45 = vpop.f32.mrf.mxu0  ;;  %v1096_v22 = vadd.f32 %v2714_v19, %v869_v2 }
 0x121   : > { %v2114_v10 = vpop.f32.mrf.mxu1  ;;  %v1570_v60 = vadd.f32 %v2627_v52, %v1555_v24  ;;  %v1542_v36 = vadd.f32 %v1479_v58, %v1315_v40  ;;  %v1318_v23 = vadd.f32 %v2088_v45, %v1090_v59  ;;  %v1095_v59 = vadd.f32 %v2604_v38, %v868_v55 }
 0x122   : > { %v1262_v46 = vpop.f32.mrf.mxu0  ;;  %v870_v21 = vadd.f32 %v2610_v6, %v636_v57 }
 0x123   : > { %v1489_v47 = vpop.f32.mrf.mxu1  ;;  %1578 = vst [vmem:[%s2634_s10 + $0x8] sm:$0xff] %v1570_v60  ;;  %v1556_v63 = vadd.f32 %v1543_v61, %v1542_v36  ;;  %v1317_v25 = vadd.f32 %v1262_v46, %v1089_v43  ;;  %v1545_v1 = vadd.f32 %v2114_v10, %v1318_v23  ;;  %v2715_v61 = vld [vmem:[#allocation10_spill] sm:$0xff] }
 0x124   : > { %v2091_v49 = vpop.f32.mrf.mxu0  ;;  %v1098_v36 = vadd.f32 %v2715_v61, %v871_v33  ;;  %v1097_v38 = vadd.f32 %v2716_v26, %v870_v21 }
 0x125   : > { %v2117_v8 = vpop.f32.mrf.mxu1  ;;  %v1571_v0 = vadd.f32 %v2627_v52, %v1556_v63  ;;  %v1544_v11 = vadd.f32 %v1489_v47, %v1317_v25  ;;  %v1320_v27 = vadd.f32 %v2091_v49, %v1092_v12 }
 0x126   : > { %v1272_v14 = vpop.f32.mrf.mxu0 }
 0x127   : > { %v1499_v50 = vpop.f32.mrf.mxu1  ;;  %1579 = vst [vmem:[%s2634_s10 + $0x10] sm:$0xff] %v1571_v0  ;;  %v1557_v3 = vadd.f32 %v1545_v1, %v1544_v11  ;;  %v1319_v29 = vadd.f32 %v1272_v14, %v1091_v39  ;;  %v1547_v5 = vadd.f32 %v2117_v8, %v1320_v27 }
 0x128   : > { %v2094_v18 = vpop.f32.mrf.mxu0 }
 0x129   : > { %v2120_v17 = vpop.f32.mrf.mxu1  ;;  %v1572_v4 = vadd.f32 %v2627_v52, %v1557_v3  ;;  %v1546_v20 = vadd.f32 %v1499_v50, %v1319_v29  ;;  %v1322_v31 = vadd.f32 %v2094_v18, %v1094_v51 }
 0x12a   : > { %v1282_v34 = vpop.f32.mrf.mxu0 }
 0x12b   : > { %v1509_v35 = vpop.f32.mrf.mxu1  ;;  %1580 = vst [vmem:[%s2634_s10 + $0x18] sm:$0xff] %v1572_v4  ;;  %v1558_v37 = vadd.f32 %v1547_v5, %v1546_v20  ;;  %v1321_v58 = vadd.f32 %v1282_v34, %v1093_v16  ;;  %v1549_v43 = vadd.f32 %v2120_v17, %v1322_v31 }
 0x12c   : > { %v2097_v24 = vpop.f32.mrf.mxu0 }
 0x12d   : > { %v2123_v40 = vpop.f32.mrf.mxu1  ;;  %v1573_v42 = vadd.f32 %v2627_v52, %v1558_v37  ;;  %v1548_v44 = vadd.f32 %v1509_v35, %v1321_v58  ;;  %v1324_v45 = vadd.f32 %v2097_v24, %v1096_v22 }
 0x12e   : > { %v1292_v10 = vpop.f32.mrf.mxu0 }
 0x12f   : > { %v1519_v60 = vpop.f32.mrf.mxu1  ;;  %1581 = vst [vmem:[%s2634_s10 + $0x20] sm:$0xff] %v1573_v42  ;;  %v1559_v41 = vadd.f32 %v1549_v43, %v1548_v44  ;;  %v1323_v23 = vadd.f32 %v1292_v10, %v1095_v59  ;;  %v1551_v12 = vadd.f32 %v2123_v40, %v1324_v45 }
 0x130   : > { %v2100_v46 = vpop.f32.mrf.mxu0 }
 0x131   : > { %v2126_v6 = vpop.f32.mrf.mxu1  ;;  %v1574_v47 = vadd.f32 %v2627_v52, %v1559_v41  ;;  %v1550_v62 = vadd.f32 %v1519_v60, %v1323_v23  ;;  %v1326_v63 = vadd.f32 %v2100_v46, %v1098_v36 }
 0x132   : > { %v1302_v25 = vpop.f32.mrf.mxu0 }
 0x133   : > { %1582 = vst [vmem:[%s2634_s10 + $0x28] sm:$0xff] %v1574_v47  ;;  %v1560_v28 = vadd.f32 %v1551_v12, %v1550_v62  ;;  %v1325_v39 = vadd.f32 %v1302_v25, %v1097_v38  ;;  %v1529_v48 = vpop.f32.mrf.mxu1  ;;  %v1553_v8 = vadd.f32 %v2126_v6, %v1326_v63 }
 0x135   : > { %v1575_v49 = vadd.f32 %v2627_v52, %v1560_v28  ;;  %v1552_v0 = vadd.f32 %v1529_v48, %v1325_v39 }
 0x137   : > { %1583 = vst [vmem:[%s2634_s10 + $0x30] sm:$0xff] %v1575_v49  ;;  %v1561_v1 = vadd.f32 %v1553_v8, %v1552_v0 }
 0x139   : > { %v1576_v11 = vadd.f32 %v2627_v52, %v1561_v1 }
 0x13b   : > { %1584 = vst [vmem:[%s2634_s10 + $0x38] sm:$0xff] %v1576_v11 }
 0x13c PF: > { %s13_s14 = sadd.s32 1, %s2174_s14   ;;  %s2717_s12 = smov %s2170_s13 }
 0x13d   : > { %p10_p5 = scmp.ge.s32.totalorder %s13_s14, 4   ;;  %s2718_s13 = smov %s2720_s15 }
 0x13f   :  { %12 = sbr.rel (!%p10_p5) target bundleno = 2 (0x2), region = 75 }

</bundles_post_ra>
